<compile_context>
chip_gen: v5e
topology: v5e:2x2
jax: 0.10.0
libtpu: 0.0.40
codegen_flags: <defaults>
</compile_context>

<pallas_src>
import functools
import math

import jax
import jax.numpy as jnp
from jax.experimental import pallas as pl
from jax.experimental.pallas import tpu as pltpu

_MIB = 1024 * 1024


def _round_up(x, m):
    return (x + m - 1) // m * m


def _padded_block_bytes(shape, dtype):
    """Padded VMEM footprint of one buffer holding `shape` of `dtype`.

    Minor dim pads to 128 lanes; second-minor pads to the native sublane tile
    (8 for 32-bit, 16 for 16-bit, 32 for 8-bit).
    """
    itemsize = jnp.dtype(dtype).itemsize
    sublane = 8 * max(1, 4 // itemsize)
    if len(shape) == 0:
        return 4
    if len(shape) == 1:
        return _round_up(shape[0], 128) * itemsize
    lead = math.prod(shape[:-2]) if len(shape) > 2 else 1
    return lead * _round_up(shape[-2], sublane) * _round_up(shape[-1], 128) * itemsize


def _generation_config(B):
    """Per-TPU-generation VMEM budget / scoped limit / grid preference."""
    cap = None
    kind = ""
    try:
        cap = int(pltpu.get_tpu_info().vmem_capacity_bytes)
    except Exception:
        cap = None
    try:
        kind = jax.devices()[0].device_kind.lower()
    except Exception:
        kind = ""

    if cap is None and (("v7" in kind) or ("tpu7" in kind)):
        cap = 64 * _MIB  # v7x-class per-TC VMEM

    if cap is not None and cap < 128 * _MIB:
        # v7x-class (64 MiB per TC, 2 TCs) or other small-VMEM part: scoped
        # limit at ~3/4 of physical, tile budget ~1/2 of that, and keep the
        # grid at >= 2 steps so the "parallel" axis shards over both cores.
        limit = int(cap * 3 // 4)
        return dict(vmem_limit=limit, budget=max(4 * _MIB, limit // 2),
                    max_bb=max(1, B // 2))
    if "v5" in kind:
        # v5e: 128 MiB physical but 16 MiB default scoped; raise explicitly
        # and use a mid-size budget (single vst slot, ~0.8 TB/s HBM stream).
        return dict(vmem_limit=64 * _MIB, budget=28 * _MIB, max_bb=B)
    if cap is not None:
        # v6e-class (128 MiB physical): raise the scoped limit toward ~96 MiB
        # and use big tiles (>=512-row tiles sit near the HBM roofline).
        return dict(vmem_limit=96 * _MIB, budget=40 * _MIB, max_bb=B)
    # Unknown hardware: stay inside every generation's default scoped VMEM.
    return dict(vmem_limit=None, budget=12 * _MIB, max_bb=B)


def _pick_batches_per_tile(B, T, C_in, H, t_out, in_dtype, budget_bytes, max_bb):
    """Largest divisor of B (<= max_bb) whose PADDED tile footprint fits."""
    max_bb = max(1, min(B, max_bb))
    best = 1
    for bb in range(1, max_bb + 1):
        if B % bb != 0:
            continue
        tile = (
            2 * _padded_block_bytes((bb, T, C_in), in_dtype)     # x (double-buffered)
            + 2 * _padded_block_bytes((bb, t_out, H), in_dtype)  # out (double-buffered)
            + _padded_block_bytes((T, H), jnp.float32)           # one batch's f32 y
            + 2 * _padded_block_bytes((C_in, H), in_dtype)       # weight (resident)
            + 2 * _padded_block_bytes((1, H), jnp.float32)       # bias (resident)
            + 2 * _padded_block_bytes((t_out, T), in_dtype)      # pool matrix (resident)
        )
        if tile <= budget_bytes:
            best = bb
    return best


def _featpool_kernel(x_ref, w_ref, b_ref, p_ref, o_ref, *, batches_per_tile, unroll):
    """One batch-tile of fused Conv1d(k=1) + ReLU + AvgPool1d.

    x_ref: (bb, T, C_in)   input features
    w_ref: (C_in, H)       pointwise conv weight (grid-invariant, resident)
    b_ref: (1, H)          conv bias (f32)
    p_ref: (T_out, T)      pooling matrix P^T, entries 1/kernel_size (resident)
    o_ref: (bb, T_out, H)  lane-dense output block (H on the lane axis)
    """
    w = w_ref[...]
    b = b_ref[...]
    pt = p_ref[...]

    def body(i, carry):
        # Chunked fusion: conv + ReLU + pool one batch at a time so only a
        # single (T, H) f32 intermediate is ever live.
        xb = x_ref[i]                                               # (T, C_in)
        yb = jnp.dot(xb, w, preferred_element_type=jnp.float32)    # MXU
        yb = jnp.maximum(yb + b, 0.0)                               # (T, H) f32
        ob = jnp.dot(pt, yb.astype(pt.dtype),                      # natural orientation
                     preferred_element_type=jnp.float32)           # (T_out, H)
        o_ref[i] = ob.astype(o_ref.dtype)
        return carry

    jax.lax.fori_loop(0, batches_per_tile, body, 0, unroll=unroll)


def feat_avg_pool(x, weight, bias, kernel_size, stride):
    """Fused FeatAvgPool forward.

    x:      (B, T, C_in)
    weight: (C_in, H)   == torch_conv.weight[:, :, 0].T
    bias:   (H,)        == torch_conv.bias
    Returns (B, H, T_out) with T_out = (T - kernel_size)//stride + 1.
    """
    B, T, C_in = x.shape
    H = weight.shape[1]
    t_out = (T - kernel_size) // stride + 1
    assert t_out >= 1, "sequence too short for the pooling window"

    cfg = _generation_config(B)
    bb = _pick_batches_per_tile(B, T, C_in, H, t_out, x.dtype,
                                cfg["budget"], cfg["max_bb"])
    grid = (B // bb,)

    # Pooling matrix with 1/k folded in: P^T[o, t] = 1/k iff
    # o*stride <= t < o*stride + kernel_size (handles overlap, gaps and the
    # PyTorch tail-drop).  Kept in the input dtype so MXU operands match.
    o_idx = jnp.arange(t_out)[:, None]
    t_idx = jnp.arange(T)[None, :]
    start = o_idx * stride
    pool_t = (((t_idx >= start) & (t_idx < start + kernel_size))
              .astype(jnp.float32) * (1.0 / kernel_size)).astype(x.dtype)  # (T_out, T)

    weight = weight.astype(x.dtype)
    bias_f32 = bias.astype(jnp.float32).reshape(1, H)

    kernel = functools.partial(_featpool_kernel,
                               batches_per_tile=bb, unroll=bool(bb <= 8))

    cp_kwargs = dict(dimension_semantics=("parallel",))
    if cfg["vmem_limit"] is not None:
        cp_kwargs["vmem_limit_bytes"] = int(cfg["vmem_limit"])

    out = pl.pallas_call(
        kernel,
        out_shape=jax.ShapeDtypeStruct((B, t_out, H), x.dtype),  # lane-dense (H minor)
        grid_spec=pltpu.PrefetchScalarGridSpec(
            num_scalar_prefetch=0,
            grid=grid,
            in_specs=[
                pl.BlockSpec((bb, T, C_in), lambda i: (i, 0, 0)),  # x batch tile
                pl.BlockSpec((C_in, H), lambda i: (0, 0)),         # weight (resident)
                pl.BlockSpec((1, H), lambda i: (0, 0)),            # bias   (resident)
                pl.BlockSpec((t_out, T), lambda i: (0, 0)),        # P^T    (resident)
            ],
            out_specs=pl.BlockSpec((bb, t_out, H), lambda i: (i, 0, 0)),
        ),
        compiler_params=pltpu.CompilerParams(**cp_kwargs),
    )(x, weight, bias_f32, pool_t)

    # Single layout transpose on HBM to PyTorch's (B, H, T_out); every
    # in-kernel store stays lane-dense.
    return jnp.transpose(out, (0, 2, 1))


def feat_avg_pool_ref(x, weight, bias, kernel_size, stride):
    """Pure-JAX reference mirroring the PyTorch forward."""
    y = jnp.maximum(jnp.einsum("btc,ch->bth", x, weight) + bias, 0.0)  # (B, T, H)
    T = x.shape[1]
    t_out = (T - kernel_size) // stride + 1
    windows = jnp.stack(
        [y[:, j: j + (t_out - 1) * stride + 1: stride, :] for j in range(kernel_size)],
        axis=0,
    )  # (k, B, T_out, H)
    pooled = windows.mean(axis=0)                                      # (B, T_out, H)
    return jnp.transpose(pooled, (0, 2, 1))                            # (B, H, T_out)


if __name__ == "__main__":
    # Module hyperparameters (small, consistent with the forward pass).
    input_size = 32   # C_in
    hidden_size = 32  # H
    kernel_size = 2
    stride = 2

    B, T = 2, 16

    key = jax.random.PRNGKey(0)
    kx, kw, kb = jax.random.split(key, 3)

    # Deterministic parameter init (Conv1d weight (H, C_in, 1) -> (C_in, H)).
    x = jax.random.normal(kx, (B, T, input_size), dtype=jnp.float32)
    weight = jax.random.normal(kw, (input_size, hidden_size), dtype=jnp.float32) * 0.1
    bias = jax.random.normal(kb, (hidden_size,), dtype=jnp.float32) * 0.1

    out = feat_avg_pool(x, weight, bias, kernel_size, stride)
    out = jax.block_until_ready(out)

    ref = feat_avg_pool_ref(x, weight, bias, kernel_size, stride)
    t_out = (T - kernel_size) // stride + 1
    assert out.shape == (B, hidden_size, t_out), out.shape
    assert jnp.allclose(out, ref, atol=1e-5, rtol=1e-5), "mismatch vs reference"

    print("KERNEL_OK")
</pallas_src>

<mosaic_0001>
module attributes {stable_mosaic.version = 11 : i64} {
  func.func @_featpool_kernel(%arg0: i32, %arg1: memref<2x16x32xf32, #tpu.memory_space<vmem>>, %arg2: memref<32x32xf32, #tpu.memory_space<vmem>>, %arg3: memref<1x32xf32, #tpu.memory_space<vmem>>, %arg4: memref<8x16xf32, #tpu.memory_space<vmem>>, %arg5: memref<2x8x32xf32, #tpu.memory_space<vmem>>) attributes {dimension_semantics = [#tpu.dimension_semantics<parallel>], iteration_bounds = array<i64: 1>, scalar_prefetch = 0 : i64, scratch_operands = 0 : i64, tpu.core_type = #tpu.core_type<tc>, window_params = [{transform_indices = @transform_0, window_bounds = array<i64: 2, 16, 32>}, {pipeline_mode = #tpu.pipeline_mode<synchronous>, transform_indices = @transform_1, window_bounds = array<i64: 32, 32>}, {pipeline_mode = #tpu.pipeline_mode<synchronous>, transform_indices = @transform_2, window_bounds = array<i64: 1, 32>}, {pipeline_mode = #tpu.pipeline_mode<synchronous>, transform_indices = @transform_3, window_bounds = array<i64: 8, 16>}, {transform_indices = @transform_4, window_bounds = array<i64: 2, 8, 32>}]} {
    %c0 = arith.constant 0 : index
    %c0_0 = arith.constant 0 : index
    %0 = vector.load %arg2[%c0, %c0_0] : memref<32x32xf32, #tpu.memory_space<vmem>>, vector<32x32xf32>
    %c0_1 = arith.constant 0 : index
    %c0_2 = arith.constant 0 : index
    %1 = vector.load %arg3[%c0_1, %c0_2] : memref<1x32xf32, #tpu.memory_space<vmem>>, vector<1x32xf32>
    %c0_3 = arith.constant 0 : index
    %c0_4 = arith.constant 0 : index
    %2 = vector.load %arg4[%c0_3, %c0_4] : memref<8x16xf32, #tpu.memory_space<vmem>>, vector<8x16xf32>
    %c0_i32 = arith.constant 0 : i32
    %3 = arith.index_cast %c0_i32 : i32 to index
    %c0_5 = arith.constant 0 : index
    %c0_6 = arith.constant 0 : index
    %4 = vector.load %arg1[%3, %c0_5, %c0_6] : memref<2x16x32xf32, #tpu.memory_space<vmem>>, vector<1x16x32xf32>
    %5 = vector.shape_cast %4 : vector<1x16x32xf32> to vector<16x32xf32>
    %cst = arith.constant dense<0.000000e+00> : vector<16x32xf32>
    %6 = tpu.matmul %5, %0, %cst {dimension_numbers = #tpu.dot_dimension_numbers<[1], [0], [0], [1], [0, 0, 1, 1], [], []>} : vector<16x32xf32>, vector<32x32xf32>, vector<16x32xf32> -> vector<16x32xf32>
    %7 = vector.broadcast %1 : vector<1x32xf32> to vector<16x32xf32>
    %8 = arith.addf %6, %7 : vector<16x32xf32>
    %cst_7 = arith.constant 0.000000e+00 : f32
    %9 = vector.broadcast %cst_7 : f32 to vector<16x32xf32>
    %10 = arith.maximumf %8, %9 : vector<16x32xf32>
    %cst_8 = arith.constant dense<0.000000e+00> : vector<8x32xf32>
    %11 = tpu.matmul %2, %10, %cst_8 {dimension_numbers = #tpu.dot_dimension_numbers<[1], [0], [0], [1], [0, 0, 1, 1], [], []>} : vector<8x16xf32>, vector<16x32xf32>, vector<8x32xf32> -> vector<8x32xf32>
    %12 = arith.index_cast %c0_i32 : i32 to index
    %c0_9 = arith.constant 0 : index
    %c0_10 = arith.constant 0 : index
    %13 = vector.load %arg5[%12, %c0_9, %c0_10] : memref<2x8x32xf32, #tpu.memory_space<vmem>>, vector<1x8x32xf32>
    %14 = vector.shape_cast %13 : vector<1x8x32xf32> to vector<8x32xf32>
    %15 = vector.shape_cast %11 : vector<8x32xf32> to vector<1x8x32xf32>
    tpu.vector_store %arg5[%12, %c0_9, %c0_10], %15 {strides = array<i32>} : memref<2x8x32xf32, #tpu.memory_space<vmem>>, vector<1x8x32xf32>,
    %c1_i32 = arith.constant 1 : i32
    %16 = arith.index_cast %c1_i32 : i32 to index
    %c0_11 = arith.constant 0 : index
    %c0_12 = arith.constant 0 : index
    %17 = vector.load %arg1[%16, %c0_11, %c0_12] : memref<2x16x32xf32, #tpu.memory_space<vmem>>, vector<1x16x32xf32>
    %18 = vector.shape_cast %17 : vector<1x16x32xf32> to vector<16x32xf32>
    %cst_13 = arith.constant dense<0.000000e+00> : vector<16x32xf32>
    %19 = tpu.matmul %18, %0, %cst_13 {dimension_numbers = #tpu.dot_dimension_numbers<[1], [0], [0], [1], [0, 0, 1, 1], [], []>} : vector<16x32xf32>, vector<32x32xf32>, vector<16x32xf32> -> vector<16x32xf32>
    %20 = vector.broadcast %1 : vector<1x32xf32> to vector<16x32xf32>
    %21 = arith.addf %19, %20 : vector<16x32xf32>
    %cst_14 = arith.constant 0.000000e+00 : f32
    %22 = vector.broadcast %cst_14 : f32 to vector<16x32xf32>
    %23 = arith.maximumf %21, %22 : vector<16x32xf32>
    %cst_15 = arith.constant dense<0.000000e+00> : vector<8x32xf32>
    %24 = tpu.matmul %2, %23, %cst_15 {dimension_numbers = #tpu.dot_dimension_numbers<[1], [0], [0], [1], [0, 0, 1, 1], [], []>} : vector<8x16xf32>, vector<16x32xf32>, vector<8x32xf32> -> vector<8x32xf32>
    %25 = arith.index_cast %c1_i32 : i32 to index
    %c0_16 = arith.constant 0 : index
    %c0_17 = arith.constant 0 : index
    %26 = vector.load %arg5[%25, %c0_16, %c0_17] : memref<2x8x32xf32, #tpu.memory_space<vmem>>, vector<1x8x32xf32>
    %27 = vector.shape_cast %26 : vector<1x8x32xf32> to vector<8x32xf32>
    %28 = vector.shape_cast %24 : vector<8x32xf32> to vector<1x8x32xf32>
    tpu.vector_store %arg5[%25, %c0_16, %c0_17], %28 {strides = array<i32>} : memref<2x8x32xf32, #tpu.memory_space<vmem>>, vector<1x8x32xf32>,
    %c2_i32 = arith.constant 2 : i32
    return
  }
  func.func @transform_0(%arg0: i32) -> (i32, i32, i32) {
    %c0_i32 = arith.constant 0 : i32
    %c0_i32_0 = arith.constant 0 : i32
    %c0_i32_1 = arith.constant 0 : i32
    return %arg0, %c0_i32, %c0_i32_0 : i32, i32, i32
  }
  func.func @transform_1(%arg0: i32) -> (i32, i32) {
    %c0_i32 = arith.constant 0 : i32
    %c0_i32_0 = arith.constant 0 : i32
    %c0_i32_1 = arith.constant 0 : i32
    return %c0_i32, %c0_i32_0 : i32, i32
  }
  func.func @transform_2(%arg0: i32) -> (i32, i32) {
    %c0_i32 = arith.constant 0 : i32
    %c0_i32_0 = arith.constant 0 : i32
    %c0_i32_1 = arith.constant 0 : i32
    return %c0_i32, %c0_i32_0 : i32, i32
  }
  func.func @transform_3(%arg0: i32) -> (i32, i32) {
    %c0_i32 = arith.constant 0 : i32
    %c0_i32_0 = arith.constant 0 : i32
    %c0_i32_1 = arith.constant 0 : i32
    return %c0_i32, %c0_i32_0 : i32, i32
  }
  func.func @transform_4(%arg0: i32) -> (i32, i32, i32) {
    %c0_i32 = arith.constant 0 : i32
    %c0_i32_0 = arith.constant 0 : i32
    %c0_i32_1 = arith.constant 0 : i32
    return %arg0, %c0_i32, %c0_i32_0 : i32, i32, i32
  }
}

</mosaic_0001>

<bundles_post_ra>
// kernel: tpu_custom_call.1
= control target key start
LH: loop header
LB: loop body
LE: loop exit
PB: predicated region body
PF: predicated region fallthrough
CT: control target
= control target key end

     0   :  { %9 = vsyncpa [#allocation3], 0  ;;  %s383_s0 = inlined_call_operand.hbm [shape: f32[2,16,32], index: 0, kind: input, shape index: {}]   ;;  %s384_s1 = inlined_call_operand.hbm [shape: f32[32,32], index: 1, kind: input, shape index: {}]   ;;  %s385_s2 = inlined_call_operand.vmem [shape: f32[1,32], index: 2, kind: input, shape index: {}]   ;;  %s386_s3 = inlined_call_operand.hbm [shape: f32[8,16], index: 3, kind: input, shape index: {}]   ;;  %s387_s4 = inlined_call_operand.hbm [shape: f32[2,8,32], index: 4, kind: output, shape index: {}]  }
   0x1   :  { %10 = vsyncpa [#allocation6], 0 }
   0x2   :  { %11 = vsyncpa [#allocation4], 0  ;;  %s29_s17 = sshll.u32 %s384_s1, 4  ;;  %s322_s18 = smov [#allocation5]   ;;  %s30_s17 = int_to_ptr.hbm [resolvable:$true] %s29_s17 }
   0x3   :  { %s31_s19 = sshll.u32 %s322_s18, 4  ;;  %s16_s22 = sshll.u32 %s383_s0, 4  ;;  %s32_s19 = int_to_ptr.vmem [resolvable:$true] %s31_s19  ;;  %s17_s22 = int_to_ptr.hbm [resolvable:$true] %s16_s22 }
   0x4   :  { %s323_s23 = smov 128   ;;  %s324_s24 = smov 8  }
   0x5   :  { %37 = dma.hbm_to_vmem [thread:$0]  %s30_s17, 512, %s32_s19, [#allocation6], %s323_s23, %s323_s23, %s324_s24  }
   0x6   :  { %s325_s25 = smov [#allocation2]   ;;  %s45_s1 = sshll.u32 %s386_s3, 4  ;;  %s46_s1 = int_to_ptr.hbm [resolvable:$true] %s45_s1 }
   0x7   :  { %s18_s26 = sshll.u32 %s325_s25, 4  ;;  %s326_s0 = smov [#allocation7]   ;;  %s19_s26 = int_to_ptr.vmem [resolvable:$true] %s18_s26 }
   0x8   :  { %24 = dma.hbm_to_vmem [thread:$0]  %s17_s22, 512, %s19_s26, [#allocation3], %s323_s23, %s323_s23, %s324_s24  }
   0x9   :  { %s47_s29 = sshll.u32 %s326_s0, 4  ;;  %s48_s29 = int_to_ptr.vmem [resolvable:$true] %s47_s29 }
   0xa   :  { %50 = dma.hbm_to_vmem [thread:$0]  %s46_s1, 128, %s48_s29, [#allocation6]  }
   0xb   :  { %316 = dma.done.wait [#allocation3], 512  }
   0xc   :  { %317 = vsyncadd [#allocation3], 4294966784 }
   0xd   :  { %318 = dma.done.wait [#allocation6], 640  }
   0xe   :  { %319 = vsyncadd [#allocation6], 4294966656  ;;  %v66_v0 = vld [vmem:[#allocation5 + $0x18] sm:$0xff]  ;;  %v65_v1 = vld [vmem:[#allocation5 + $0x10] sm:$0xff]  ;;  %vm74_vm0 = vcmask 261120   ;;  %vm106_vm1 = vcmask 130048  }
   0xf   :  { %152 = vmatpush.msra.mxu2 %v66_v0  ;;  %93 = vmatpush.msra.mxu0 %v66_v0  ;;  %v64_v2 = vld [vmem:[#allocation5 + $0x8] sm:$0xff]  ;;  %v63_v3 = vld [vmem:[#allocation5] sm:$0xff]  ;;  %v132_v4 = vld [vmem:[#allocation2 + $0x10] sm:$0xff]  ;;  %s193_s8 = sshll.u32 %s387_s4, 4  ;;  %s194_s8 = int_to_ptr.hbm [resolvable:$true] %s193_s8 }
  0x10   :  { %v69_v5 = vld [vmem:[#allocation2] sm:$0xff]  ;;  %v133_v6 = vld [vmem:[#allocation2 + $0x18] sm:$0xff]  ;;  %v70_v7 = vld [vmem:[#allocation2 + $0x8] sm:$0xff] }
  0x11   :  { %153 = vmatpush.msra.mxu2 %v65_v1  ;;  %94 = vmatpush.msra.mxu0 %v65_v1  ;;  %v219_v9 = vld [vmem:[%s385_s2] ss:$0 sm:$0xff]  ;;  %s327_s2 = smov [#allocation8]  }
  0x12   :  { %v68_v19 = vld [vmem:[#allocation7] sm:$0xff]  ;;  %s191_s5 = sshll.u32 %s327_s2, 4  ;;  %s192_s5 = int_to_ptr.vmem [resolvable:$true] %s191_s5 }
  0x13   :  { %154 = vmatpush.msra.mxu2 %v64_v2  ;;  %95 = vmatpush.msra.mxu0 %v64_v2 }
  0x15   :  { %155 = vmatpush.msra.mxu2 %v63_v3  ;;  %96 = vmatpush.msra.mxu0 %v63_v3 }
  0x16   :  { %210 = vmatmul.msk.f32.vlgmr.msra.gmra.mxu2 %vm74_vm0, %v132_v4  ;;  %207 = vmatmul.msk.f32.vlgmr.msra.gmra.mxu0 %vm74_vm0, %v69_v5 }
  0x1e   :  { %211 = vmatmul.msk.f32.gmra.mxu2 %vm74_vm0, %v133_v6  ;;  %208 = vmatmul.msk.f32.gmra.mxu0 %vm74_vm0, %v70_v7 }
  0x93   :  { %v98_v8 = vpop.f32.mrf.mxu0 }
  0x94   :  { %v99_v11 = vadd.f32 %v219_v9, %v98_v8 }
  0x96   :  { %v104_v14 = vmax.f32 %v99_v11, 0.0 }
  0x99   :  { %v157_v10 = vpop.f32.mrf.mxu2 }
  0x9a   :  { %v158_v17 = vadd.f32 %v219_v9, %v157_v10 }
  0x9b   :  { %v101_v12 = vpop.f32.mrf.mxu0 }
  0x9c   :  { %v102_v13 = vadd.f32 %v219_v9, %v101_v12  ;;  %v163_v21 = vmax.f32 %v158_v17, 0.0 }
  0x9e   :  { %v105_v15 = vmax.f32 %v102_v13, 0.0 }
  0xa0   :  { %124 = vmatpush.msra.mxu1 %v105_v15 }
  0xa1   :  { %v160_v16 = vpop.f32.mrf.mxu2 }
  0xa2   :  { %125 = vmatpush.msra.mxu1 %v104_v14  ;;  %v161_v18 = vadd.f32 %v219_v9, %v160_v16 }
  0xa3   :  { %209 = vmatmul.msk.f32.vlgmr.msra.gmra.mxu1 %vm106_vm1, %v68_v19 }
  0xa4   :  { %v164_v20 = vmax.f32 %v161_v18, 0.0 }
  0xa6   :  { %179 = vmatpush.msra.mxu3 %v164_v20 }
  0xa8   :  { %180 = vmatpush.msra.mxu3 %v163_v21 }
  0xa9   :  { %212 = vmatmul.msk.f32.vlgmr.msra.gmra.mxu3 %vm106_vm1, %v68_v19 }
 0x120   :  { %v127_v22 = vpop.f32.mrf.mxu1 }
 0x121   :  { %130 = vst.msk [vmem:[#allocation8] sm:$0xff] %vm74_vm0, %v127_v22 }
 0x12c   :  { %v182_v23 = vpop.f32.mrf.mxu3 }
 0x12d   :  { %186 = vst.msk [vmem:[#allocation8 + $0x8] sm:$0xff] %vm74_vm0, %v182_v23 }
 0x12e   :  { %199 = dma.vmem_to_hbm [thread:$0]  %s192_s5, 256, %s194_s8, [#allocation4], %s323_s23, %s323_s23, %s324_s24  }
 0x12f   :  { %320 = dma.done.wait [#allocation4], 256  }
 0x130   :  { %321 = vsyncadd [#allocation4], 4294967040 }
 0x131   :  { %204 = vsyncpa [#allocation3], 1 }
 0x132   :  { %205 = vsyncpa [#allocation6], 1 }
 0x133   :  { %206 = vsyncpa [#allocation4], 1 }

</bundles_post_ra>
